<compile_context>
chip_gen: v6e
topology: v6e:2x2x1
jax: 0.10.0
libtpu: 0.0.40
codegen_flags: <defaults>
</compile_context>

<pallas_src>
import jax
import jax.numpy as jnp
from jax.experimental import pallas as pl
from jax.experimental.pallas import tpu as pltpu

LANES = 512        # lane-dense last dim (multiple of 128) -> full-width vst
TILE_ROWS = 1024   # rows per grid step: 1024 * 512 * 4 B = 2 MiB per block


def _round_up(x: int, m: int) -> int:
    return ((x + m - 1) // m) * m


def linear_kernel(x_ref, w_ref, b_ref, o_ref):
    # y = x * w + b : one f32 multiply-add per vreg on the VPU.
    # (Deliberately NOT routed through the MXU: a K=1 contraction would waste
    #  >99% of the systolic array while remaining HBM-bound.)
    w = w_ref[0, 0]   # scalar weight from SMEM
    b = b_ref[0]      # scalar bias from SMEM
    o_ref[...] = x_ref[...] * w + b


def linear_regression_v2(x, weight, bias):
    """x: (N, 1) f32, weight: (1, 1) f32, bias: (1,) f32 -> (N, 1) f32."""
    n = x.shape[0]

    # ---- wrapper-side layout: lane-dense slab + padding for clean tiling ----
    flat = x.reshape(-1)                          # (N,) since in_features == 1
    rows = pl.cdiv(n, LANES)                      # rows of the (rows, LANES) slab
    tile_r = min(TILE_ROWS, _round_up(rows, 8))   # block rows, multiple of 8
    padded_rows = _round_up(rows, tile_r)         # whole number of tiles
    padded_n = padded_rows * LANES
    if padded_n != n:
        flat = jnp.pad(flat, (0, padded_n - n))   # pad region sliced off below
    slab = flat.reshape(padded_rows, LANES)

    grid = (padded_rows // tile_r,)

    out = pl.pallas_call(
        linear_kernel,
        out_shape=jax.ShapeDtypeStruct((padded_rows, LANES), jnp.float32),
        grid=grid,
        in_specs=[
            pl.BlockSpec((tile_r, LANES), lambda i: (i, 0)),        # x slab tile
            pl.BlockSpec(memory_space=pltpu.MemorySpace.SMEM),      # weight (1,1)
            pl.BlockSpec(memory_space=pltpu.MemorySpace.SMEM),      # bias (1,)
        ],
        out_specs=pl.BlockSpec((tile_r, LANES), lambda i: (i, 0)),
        compiler_params=pltpu.CompilerParams(
            dimension_semantics=("parallel",),    # shard across TCs (v7x megacore)
        ),
    )(slab, weight, bias)

    # Undo the layout plumbing: drop padding, restore (N, 1).
    return out.reshape(-1)[:n].reshape(n, 1)


if __name__ == "__main__":
    # Deterministic parameter init (shapes from nn.Linear(1, 1)):
    # weight: (out_features, in_features) = (1, 1), bias: (1,)
    weight = jnp.array([[0.7]], dtype=jnp.float32)
    bias = jnp.array([0.3], dtype=jnp.float32)

    key = jax.random.PRNGKey(0)

    # Small deterministic input, consistent with the module's (N, 1) usage.
    x = jax.random.normal(key, (8, 1), dtype=jnp.float32)
    y = linear_regression_v2(x, weight, bias)
    jax.block_until_ready(y)
    y_ref = x @ weight.T + bias
    assert y.shape == (8, 1) and y.dtype == jnp.float32
    assert jnp.allclose(y, y_ref, atol=1e-6, rtol=1e-6)

    # Second check with a ragged N (exercises the padding / slicing path).
    x2 = jax.random.normal(jax.random.PRNGKey(1), (1000, 1), dtype=jnp.float32)
    y2 = linear_regression_v2(x2, weight, bias)
    jax.block_until_ready(y2)
    y2_ref = x2 @ weight.T + bias
    assert y2.shape == (1000, 1) and y2.dtype == jnp.float32
    assert jnp.allclose(y2, y2_ref, atol=1e-6, rtol=1e-6)

    print("KERNEL_OK")
</pallas_src>

<mosaic_0001>
module attributes {stable_mosaic.version = 11 : i64} {
  func.func @linear_kernel(%arg0: i32, %arg1: memref<8x512xf32, #tpu.memory_space<vmem>>, %arg2: memref<1x1xf32, #tpu.memory_space<smem>>, %arg3: memref<1xf32, #tpu.memory_space<smem>>, %arg4: memref<8x512xf32, #tpu.memory_space<vmem>>) attributes {dimension_semantics = [#tpu.dimension_semantics<parallel>], iteration_bounds = array<i64: 1>, scalar_prefetch = 0 : i64, scratch_operands = 0 : i64, tpu.core_type = #tpu.core_type<tc>, window_params = [{transform_indices = @transform_0, window_bounds = array<i64: 8, 512>}, {transform_indices = @transform_1, window_bounds = array<i64: 1, 1>}, {transform_indices = @transform_2, window_bounds = array<i64: 1>}, {transform_indices = @transform_3, window_bounds = array<i64: 8, 512>}]} {
    %c0 = arith.constant 0 : index
    %c0_0 = arith.constant 0 : index
    %0 = memref.load %arg2[%c0, %c0_0] : memref<1x1xf32, #tpu.memory_space<smem>>
    %c0_1 = arith.constant 0 : index
    %1 = memref.load %arg3[%c0_1] : memref<1xf32, #tpu.memory_space<smem>>
    %c0_2 = arith.constant 0 : index
    %c0_3 = arith.constant 0 : index
    %2 = vector.load %arg1[%c0_2, %c0_3] : memref<8x512xf32, #tpu.memory_space<vmem>>, vector<8x512xf32>
    %3 = vector.broadcast %0 : f32 to vector<8x512xf32>
    %4 = arith.mulf %2, %3 : vector<8x512xf32>
    %5 = vector.broadcast %1 : f32 to vector<8x512xf32>
    %6 = arith.addf %4, %5 : vector<8x512xf32>
    %c0_4 = arith.constant 0 : index
    %c0_5 = arith.constant 0 : index
    %7 = vector.load %arg4[%c0_4, %c0_5] : memref<8x512xf32, #tpu.memory_space<vmem>>, vector<8x512xf32>
    tpu.vector_store %arg4[%c0_4, %c0_5], %6 {strides = array<i32>} : memref<8x512xf32, #tpu.memory_space<vmem>>, vector<8x512xf32>,
    return
  }
  func.func @transform_0(%arg0: i32) -> (i32, i32) {
    %c0_i32 = arith.constant 0 : i32
    %c0_i32_0 = arith.constant 0 : i32
    return %arg0, %c0_i32 : i32, i32
  }
  func.func @transform_1(%arg0: i32) -> (i32, i32) {
    %c0_i32 = arith.constant 0 : i32
    %c0_i32_0 = arith.constant 0 : i32
    %c0_i32_1 = arith.constant 0 : i32
    return %c0_i32, %c0_i32_0 : i32, i32
  }
  func.func @transform_2(%arg0: i32) -> i32 {
    %c0_i32 = arith.constant 0 : i32
    %c0_i32_0 = arith.constant 0 : i32
    return %c0_i32 : i32
  }
  func.func @transform_3(%arg0: i32) -> (i32, i32) {
    %c0_i32 = arith.constant 0 : i32
    %c0_i32_0 = arith.constant 0 : i32
    return %arg0, %c0_i32 : i32, i32
  }
}

</mosaic_0001>

<bundles_post_ra>
// kernel: tpu_custom_call.1
= control target key start
LH: loop header
LB: loop body
LE: loop exit
PB: predicated region body
PF: predicated region fallthrough
CT: control target
= control target key end

     0   :  { %10 = vsyncpa [#allocation5], 0  ;;  %s144_s0 = inlined_call_operand.hbm [shape: f32[8,512], index: 0, kind: input, shape index: {}]   ;;  %s145_s1 = inlined_call_operand.<no memory space> [shape: f32[1,1], index: 1, kind: input, shape index: {}]   ;;  %s146_s2 = inlined_call_operand.<no memory space> [shape: f32[1], index: 2, kind: input, shape index: {}]   ;;  %s147_s3 = inlined_call_operand.hbm [shape: f32[8,512], index: 3, kind: output, shape index: {}]  }
   0x1   :  { %11 = vsyncpa [#allocation6], 0  ;;  %s110_s12 = smov [#allocation4]  }
   0x2   :  { %s18_s13 = sshll.u32 %s110_s12, 4  ;;  %s19_s13 = int_to_ptr.vmem [resolvable:$true] %s18_s13 }
   0x3   :  { %s74_s14 = scalar_lea.vmem %s19_s13, 512  ;;  %p79_p1 = scmp.lt.s32.totalorder %s19_s13, %s19_s13 }
   0x4   :  { %p75_p0 = scmp.ne.s32.totalorder %s19_s13, %s74_s14  ;;  %p80_p2 = scmp.lt.s32.totalorder %s74_s14, %s74_s14 }
   0x6   :  { %p81_p3 = por %p80_p2, %p79_p1 }
   0x8   :  { %p82_p4 = pnand %p81_p3, %p75_p0 }
   0xa   :  { %85 = shalt.err (!%p82_p4)
}
   0xb   :  { %21 = dma.hbm_to_vmem [thread:$0]  %s144_s0, 512, %s19_s13, [#allocation5]  }
   0xc   :  { %106 = dma.done.wait [#allocation5], 512  }
   0xd   :  { %107 = vsyncadd [#allocation5], 4294966784  ;;  %v35_v0 = vstv %s145_s1  ;;  %v31_v1 = vld [vmem:[#allocation4] sm:$0xff]  ;;  %v40_v2 = vstv %s146_s2  ;;  %v32_v3 = vld [vmem:[#allocation4 + $0x8] sm:$0xff]  ;;  %s111_s21 = smov [#allocation7]  }
   0xe   :  { %v33_v4 = vld [vmem:[#allocation4 + $0x10] sm:$0xff]  ;;  %v36_v5 = vmul.f32 %v35_v0, %v31_v1  ;;  %v37_v6 = vmul.f32 %v35_v0, %v32_v3  ;;  %v34_v8 = vld [vmem:[#allocation4 + $0x18] sm:$0xff]  ;;  %s55_s22 = sshll.u32 %s111_s21, 4  ;;  %s56_s22 = int_to_ptr.vmem [resolvable:$true] %s55_s22 }
   0xf   :  { %v38_v7 = vmul.f32 %v35_v0, %v33_v4  ;;  %v39_v9 = vmul.f32 %v35_v0, %v34_v8  ;;  %s86_s0 = scalar_lea.vmem %s56_s22, 512  ;;  %p91_p6 = scmp.lt.s32.totalorder %s56_s22, %s56_s22 }
  0x10   :  { %v41_v10 = vadd.f32 %v40_v2, %v36_v5  ;;  %v42_v11 = vadd.f32 %v40_v2, %v37_v6  ;;  %p87_p5 = scmp.ne.s32.totalorder %s56_s22, %s86_s0  ;;  %p92_p7 = scmp.lt.s32.totalorder %s86_s0, %s86_s0 }
  0x11   :  { %v43_v12 = vadd.f32 %v40_v2, %v38_v7  ;;  %v44_v13 = vadd.f32 %v40_v2, %v39_v9 }
  0x12   :  { %45 = vst [vmem:[#allocation7] sm:$0xff] %v41_v10  ;;  %46 = vst [vmem:[#allocation7 + $0x8] sm:$0xff] %v42_v11  ;;  %p93_p8 = por %p92_p7, %p91_p6 }
  0x13   :  { %47 = vst [vmem:[#allocation7 + $0x10] sm:$0xff] %v43_v12  ;;  %48 = vst [vmem:[#allocation7 + $0x18] sm:$0xff] %v44_v13 }
  0x14   :  { %p94_p9 = pnand %p93_p8, %p87_p5 }
  0x16   :  { %97 = shalt.err (!%p94_p9)
}
  0x17   :  { %58 = dma.vmem_to_hbm [thread:$0]  %s56_s22, 512, %s147_s3, [#allocation6]  }
  0x18   :  { %108 = dma.done.wait [#allocation6], 512  }
  0x19   :  { %109 = vsyncadd [#allocation6], 4294966784 }
  0x1a   :  { %62 = vsyncpa [#allocation5], 1 }
  0x1b   :  { %63 = vsyncpa [#allocation6], 1 }

</bundles_post_ra>
